<compile_context>
chip_gen: v7x
topology: tpu7x:2x2x1
jax: 0.10.0
libtpu: 0.0.40
codegen_flags: <defaults>
</compile_context>

<pallas_src>
import functools
import math

import numpy as np
import jax
import jax.numpy as jnp
from jax.experimental import pallas as pl
from jax.experimental.pallas import tpu as pltpu


# ---------------------------------------------------------------------------
# Small helpers
# ---------------------------------------------------------------------------
def _pick_tile(total, preferred, quantum):
    """Largest multiple of `quantum` that divides `total` and is <= `preferred`
    (falls back to the full extent for tiny / awkward sizes)."""
    if total <= preferred:
        return total
    best = total
    m = quantum
    while m <= preferred:
        if total % m == 0:
            best = m
        m += quantum
    return best


def _vmem_limit_bytes():
    """Per-generation scoped-VMEM budget: ~3/4 of physical, capped at 96 MiB
    (v5e/v6e: 128 MiB physical -> 96 MiB; v7x: 64 MiB -> 48 MiB)."""
    phys = 128 * 1024 * 1024
    try:
        phys = int(pltpu.get_tpu_info().vmem_capacity_bytes)
    except Exception:
        pass
    return int(min(phys * 3 // 4, 96 * 1024 * 1024))


def _grid_invariant_spec(block_shape, index_map):
    """BlockSpec for operands whose block index never changes over the grid:
    single-buffer them (reclaims their second VMEM buffer at zero perf cost).
    Falls back to a plain BlockSpec on JAX versions without pipeline_mode."""
    if hasattr(pl, "Buffered"):
        try:
            return pl.BlockSpec(block_shape, index_map,
                                pipeline_mode=pl.Buffered(1))
        except Exception:
            pass
    return pl.BlockSpec(block_shape, index_map)


# ---------------------------------------------------------------------------
# Pass 1: K / K_rope / V projection into lane-dense (heads, D, T) caches.
# grid = (B, T // TKV), both parallel.
# ---------------------------------------------------------------------------
def kv_proj_kernel(x_ref, wkv_ref, cos_ref, sin_ref, kall_ref, vt_ref, *,
                   n_heads, d_head):
    H, D = n_heads, d_head
    half = D // 2
    f32, bf16 = jnp.float32, jnp.bfloat16

    xk = x_ref[0]                                                  # (TT, C) bf16
    # Fused K|V projection: one MXU matmul with K=C contraction depth.
    kv = jnp.dot(xk, wkv_ref[...], preferred_element_type=f32)    # (TT, 2C)
    cs = cos_ref[...]                                              # (TT, D) f32
    sn = sin_ref[...]                                              # (TT, D) f32

    # Static per-head loop (runs once per (batch, seq-tile); amortized over
    # all query tiles). 2D transposes make the caches T-minor (lane-dense).
    for h in range(H):
        k_h = kv[:, h * D:(h + 1) * D]                             # (TT, D)
        v_h = kv[:, (H + h) * D:(H + h + 1) * D]                   # (TT, D)
        # Rotate-half RoPE (channels are pre-permuted [evens, odds] per head).
        k_rot = jnp.concatenate([-k_h[:, half:], k_h[:, :half]], axis=-1)
        kr_h = k_h * cs + k_rot * sn
        kall_ref[0, h] = kr_h.T.astype(bf16)                       # RoPE'd K, (D, TT)
        kall_ref[0, H + h] = k_h.T.astype(bf16)                    # raw    K, (D, TT)
        vt_ref[0, h] = v_h.T.astype(bf16)                          # V,       (D, TT)


# ---------------------------------------------------------------------------
# Pass 2: attention + out-projection + residual + LayerNorm.
# grid = (B, T // TQ), both parallel.  Inner loop streams K/V in TK blocks.
# ---------------------------------------------------------------------------
def rope_attn_kernel(x_ref, kall_ref, vt_ref, wq_ref, wout_ref, cos_ref,
                     sin_ref, gamma_ref, beta_ref, o_ref, *,
                     n_heads, d_head, tq, tk):
    H, D = n_heads, d_head
    half = D // 2
    f32, bf16 = jnp.float32, jnp.bfloat16
    T = kall_ref.shape[-1]
    nk = T // tk

    # --- Q projection (scale already folded into Wq on the host) -----------
    x_q = x_ref[0]                                                 # (TQ, C) f32
    q = jnp.dot(x_q.astype(bf16), wq_ref[...],
                preferred_element_type=f32)                        # (TQ, C)
    q_h = jnp.concatenate(
        [q[None, :, h * D:(h + 1) * D] for h in range(H)], axis=0)  # (H, TQ, D)

    q_start = pl.multiple_of(pl.program_id(1) * tq, tq)
    cs = cos_ref[pl.ds(q_start, tq), :]                            # (TQ, D)
    sn = sin_ref[pl.ds(q_start, tq), :]
    q_rot = jnp.concatenate([-q_h[..., half:], q_h[..., :half]], axis=-1)
    qr_h = q_h * cs[None] + q_rot * sn[None]                       # RoPE'd Q
    q_all = jnp.concatenate([qr_h, q_h], axis=0).astype(bf16)      # (2H, TQ, D)

    # --- K-block streaming: exact accumulation (no max-subtraction in the
    #     module), so the full (2H, TQ, T) score slab never exists. ---------
    def body(i, carry):
        y_acc, den = carry
        k0 = pl.multiple_of(i * tk, tk)
        k_blk = kall_ref[0, :, :, pl.ds(k0, tk)]                   # (2H, D, TK) bf16
        v_blk = vt_ref[0, :, :, pl.ds(k0, tk)]                     # (H,  D, TK) bf16
        e = jnp.exp(jnp.einsum('hqd,hdk->hqk', q_all, k_blk,
                               preferred_element_type=f32))        # (2H, TQ, TK)
        den = den + jnp.sum(e[H:], axis=-1, keepdims=True)         # raw-score denom
        y_acc = y_acc + jnp.einsum('hqk,hdk->hqd', e[:H].astype(bf16), v_blk,
                                   preferred_element_type=f32)     # (H, TQ, D)
        return y_acc, den

    init = (jnp.zeros((H, tq, D), f32), jnp.zeros((H, tq, 1), f32))
    if nk == 1:
        y_h, den = body(0, init)
    else:
        y_h, den = jax.lax.fori_loop(0, nk, body, init, unroll=(nk <= 8))

    # Normalize once at the end (den is constant over K blocks) on the EUP.
    y_h = y_h * pl.reciprocal(den, approx=True)                    # (H, TQ, D) f32

    # --- head merge -> (TQ, C); single K=C output projection ---------------
    y = jnp.concatenate([y_h[h] for h in range(H)], axis=-1).astype(bf16)
    y = jnp.dot(y, wout_ref[...], preferred_element_type=f32)      # (TQ, C) f32

    # --- residual + LayerNorm (f32) -----------------------------------------
    y = y + x_q
    mean = jnp.mean(y, axis=-1, keepdims=True)
    var = jnp.mean(jnp.square(y - mean), axis=-1, keepdims=True)
    out = (y - mean) * jax.lax.rsqrt(var + 1e-5) * gamma_ref[...] + beta_ref[...]
    o_ref[0] = out.astype(o_ref.dtype)


# ---------------------------------------------------------------------------
# Wrapper: host-side weight prep (head permutation, scale folding, K|V fusion)
# and the two pallas_calls.
# ---------------------------------------------------------------------------
def rope_attn_forward(x, wqkv_t, wout_t, gamma, beta, rope_cos, rope_sin,
                      n_heads, *, tq=None, tk=None, tkv=None):
    B, T, C = x.shape
    H = n_heads
    D = C // H
    bf16 = jnp.bfloat16
    scale = 1.0 / math.sqrt(D)

    # Per-generation-ish tile choices (TODO(synk): sweep per chip).
    tq = tq or _pick_tile(T, 256, 8)      # query rows per step
    tk = tk or _pick_tile(T, 256, 128)    # K/V columns per inner streaming step
    tkv = tkv or _pick_tile(T, 512, 128)  # seq rows per KV-projection step
    assert T % tq == 0 and T % tk == 0 and T % tkv == 0

    # Within-head [even channels, odd channels] permutation: applied to the
    # columns of Wq^T / Wk^T and to the RoPE tables.  q.k^T is invariant, so
    # attention / V / output are mathematically unchanged, but eq. (34)
    # becomes a plain rotate-half inside the kernels.
    perm_idx = np.concatenate([np.arange(0, D, 2), np.arange(1, D, 2)])
    col_perm = np.concatenate([h * D + perm_idx for h in range(H)])

    wq_t = (wqkv_t[:, 0:C][:, col_perm] * scale).astype(bf16)       # scale folded in
    wk_t = wqkv_t[:, C:2 * C][:, col_perm]
    wv_t = wqkv_t[:, 2 * C:3 * C]
    wkv_t = jnp.concatenate([wk_t, wv_t], axis=1).astype(bf16)      # fused K|V proj
    wout_b = wout_t.astype(bf16)

    cos_p = rope_cos[:T][:, perm_idx].astype(jnp.float32)           # (T, D)
    sin_p = rope_sin[:T][:, perm_idx].astype(jnp.float32)           # (T, D)

    vmem_limit = _vmem_limit_bytes()

    # ---- pass 1: K / K_rope / V caches in lane-dense (heads, D, T) layout --
    kv_kernel = functools.partial(kv_proj_kernel, n_heads=H, d_head=D)
    kall, v_t = pl.pallas_call(
        kv_kernel,
        out_shape=(jax.ShapeDtypeStruct((B, 2 * H, D, T), bf16),
                   jax.ShapeDtypeStruct((B, H, D, T), bf16)),
        grid=(B, T // tkv),
        in_specs=[
            pl.BlockSpec((1, tkv, C), lambda b, t: (b, t, 0)),       # x (bf16)
            _grid_invariant_spec((C, 2 * C), lambda b, t: (0, 0)),   # [Wk^T|Wv^T]
            pl.BlockSpec((tkv, D), lambda b, t: (t, 0)),             # cos rows
            pl.BlockSpec((tkv, D), lambda b, t: (t, 0)),             # sin rows
        ],
        out_specs=(pl.BlockSpec((1, 2 * H, D, tkv), lambda b, t: (b, 0, 0, t)),
                   pl.BlockSpec((1, H, D, tkv), lambda b, t: (b, 0, 0, t))),
        compiler_params=pltpu.CompilerParams(
            dimension_semantics=("parallel", "parallel"),
            vmem_limit_bytes=vmem_limit),
    )(x.astype(bf16), wkv_t, cos_p, sin_p)

    # ---- pass 2: attention + out-proj + residual + LayerNorm ---------------
    attn_kernel = functools.partial(rope_attn_kernel, n_heads=H, d_head=D,
                                    tq=tq, tk=tk)
    return pl.pallas_call(
        attn_kernel,
        out_shape=jax.ShapeDtypeStruct((B, T, C), x.dtype),
        grid=(B, T // tq),
        in_specs=[
            pl.BlockSpec((1, tq, C), lambda b, q: (b, q, 0)),        # x query tile (f32)
            pl.BlockSpec((1, 2 * H, D, T), lambda b, q: (b, 0, 0, 0)),  # K caches
            pl.BlockSpec((1, H, D, T), lambda b, q: (b, 0, 0, 0)),   # V cache
            _grid_invariant_spec((C, C), lambda b, q: (0, 0)),       # Wq^T (perm+scaled)
            _grid_invariant_spec((C, C), lambda b, q: (0, 0)),       # Wout^T
            _grid_invariant_spec((T, D), lambda b, q: (0, 0)),       # cos
            _grid_invariant_spec((T, D), lambda b, q: (0, 0)),       # sin
            _grid_invariant_spec((1, C), lambda b, q: (0, 0)),       # LN gamma
            _grid_invariant_spec((1, C), lambda b, q: (0, 0)),       # LN beta
        ],
        out_specs=pl.BlockSpec((1, tq, C), lambda b, q: (b, q, 0)),
        compiler_params=pltpu.CompilerParams(
            dimension_semantics=("parallel", "parallel"),
            vmem_limit_bytes=vmem_limit),
    )(x, kall, v_t, wq_t, wout_b, cos_p, sin_p, gamma, beta)


# ---------------------------------------------------------------------------
# Reference (mirrors the PyTorch forward; bf16-cast at the same matmul points
# as the kernel so the comparison isolates structural correctness).
# ---------------------------------------------------------------------------
def reference_forward(x, wqkv_t, wout_t, gamma, beta, rope_cos, rope_sin,
                      n_heads):
    B, T, C = x.shape
    D = C // n_heads
    scale = 1.0 / math.sqrt(D)
    bf16, f32 = jnp.bfloat16, jnp.float32

    def mm(a, b):
        return jnp.dot(a.astype(bf16), b.astype(bf16), preferred_element_type=f32)

    def ein(s, a, b):
        return jnp.einsum(s, a.astype(bf16), b.astype(bf16),
                          preferred_element_type=f32)

    qkv = mm(x, wqkv_t)
    q, k, v = qkv[..., :C], qkv[..., C:2 * C], qkv[..., 2 * C:]

    def split(a):
        return a.reshape(B, T, n_heads, D).transpose(0, 2, 1, 3)

    q, k, v = split(q), split(k), split(v)

    def reorder(a):
        a_odd = a[..., 0::2]
        a_even = a[..., 1::2]
        return jnp.stack([-a_even, a_odd], axis=-1).reshape(a.shape)

    def rope(a):
        return a * rope_cos[:T] + reorder(a) * rope_sin[:T]

    qr, kr = rope(q), rope(k)
    num = jnp.exp(ein('bhqd,bhkd->bhqk', qr, kr) * scale)
    den = jnp.sum(jnp.exp(ein('bhqd,bhkd->bhqk', q, k) * scale),
                  axis=-1, keepdims=True)
    att = num / den
    y = ein('bhqk,bhkd->bhqd', att, v)
    y = y.transpose(0, 2, 1, 3).reshape(B, T, C)
    y = mm(y, wout_t)
    y = y + x
    mean = jnp.mean(y, axis=-1, keepdims=True)
    var = jnp.mean(jnp.square(y - mean), axis=-1, keepdims=True)
    return (y - mean) / jnp.sqrt(var + 1e-5) * gamma.reshape(-1) + beta.reshape(-1)


# ---------------------------------------------------------------------------
if __name__ == "__main__":
    B, T = 2, 8
    d_model, n_heads = 32, 4
    d_head = d_model // n_heads
    max_pos_enc_len = 16

    key = jax.random.PRNGKey(0)
    kx, k1, k2, k3, k4 = jax.random.split(key, 5)

    # PyTorch-equivalent parameters, passed pre-transposed (x @ W^T = x @ W_t).
    wqkv_t = (jax.random.normal(k1, (d_model, 3 * d_model), jnp.float32)
              * (1.0 / math.sqrt(d_model)))
    wout_t = (jax.random.normal(k2, (d_model, d_model), jnp.float32)
              * (1.0 / math.sqrt(d_model)))
    gamma = 1.0 + 0.1 * jax.random.normal(k3, (1, d_model), jnp.float32)
    beta = 0.1 * jax.random.normal(k4, (1, d_model), jnp.float32)

    # RoPE tables exactly as in _construct_rope_matrices (1-indexed positions).
    i = jnp.arange(1, d_head // 2 + 1, dtype=jnp.float32)
    thetas = jnp.repeat(1000.0 ** (-2.0 * i / d_head), 2)                # (d_head,)
    positions = jnp.arange(1, max_pos_enc_len + 1, dtype=jnp.float32)
    args = positions[:, None] * thetas[None, :]                          # (max_pos, d_head)
    rope_cos = jnp.cos(args)
    rope_sin = jnp.sin(args)

    x = jax.random.normal(kx, (B, T, d_model), jnp.float32)

    out = rope_attn_forward(x, wqkv_t, wout_t, gamma, beta,
                            rope_cos, rope_sin, n_heads)
    out = jax.block_until_ready(out)

    ref = reference_forward(x, wqkv_t, wout_t, gamma, beta,
                            rope_cos, rope_sin, n_heads)
    # 2e-2 tolerance accommodates bf16 matmul operands + approx reciprocal.
    np.testing.assert_allclose(np.asarray(out), np.asarray(ref),
                               rtol=2e-2, atol=2e-2)

    print("KERNEL_OK")
</pallas_src>

<mosaic_0001>
module attributes {stable_mosaic.version = 11 : i64} {
  func.func @kv_proj_kernel(%arg0: i32, %arg1: i32, %arg2: memref<1x8x32xbf16, #tpu.memory_space<vmem>>, %arg3: memref<32x64xbf16, #tpu.memory_space<vmem>>, %arg4: memref<8x8xf32, #tpu.memory_space<vmem>>, %arg5: memref<8x8xf32, #tpu.memory_space<vmem>>, %arg6: memref<1x8x8x8xbf16, #tpu.memory_space<vmem>>, %arg7: memref<1x4x8x8xbf16, #tpu.memory_space<vmem>>) attributes {dimension_semantics = [#tpu.dimension_semantics<parallel>, #tpu.dimension_semantics<parallel>], iteration_bounds = array<i64: 2, 1>, scalar_prefetch = 0 : i64, scratch_operands = 0 : i64, tpu.core_type = #tpu.core_type<tc>, window_params = [{transform_indices = @transform_0, window_bounds = array<i64: 1, 8, 32>}, {pipeline_mode = #tpu.pipeline_mode<synchronous>, transform_indices = @transform_1, window_bounds = array<i64: 32, 64>}, {transform_indices = @transform_2, window_bounds = array<i64: 8, 8>}, {transform_indices = @transform_3, window_bounds = array<i64: 8, 8>}, {transform_indices = @transform_4, window_bounds = array<i64: 1, 8, 8, 8>}, {transform_indices = @transform_5, window_bounds = array<i64: 1, 4, 8, 8>}]} {
    %c0 = arith.constant 0 : index
    %c0_0 = arith.constant 0 : index
    %c0_1 = arith.constant 0 : index
    %0 = vector.load %arg2[%c0, %c0_0, %c0_1] : memref<1x8x32xbf16, #tpu.memory_space<vmem>>, vector<1x8x32xbf16>
    %1 = vector.shape_cast %0 : vector<1x8x32xbf16> to vector<8x32xbf16>
    %c0_2 = arith.constant 0 : index
    %c0_3 = arith.constant 0 : index
    %2 = vector.load %arg3[%c0_2, %c0_3] : memref<32x64xbf16, #tpu.memory_space<vmem>>, vector<32x64xbf16>
    %cst = arith.constant dense<0.000000e+00> : vector<8x64xf32>
    %3 = tpu.matmul %1, %2, %cst {dimension_numbers = #tpu.dot_dimension_numbers<[1], [0], [0], [1], [0, 0, 1, 1], [], []>} : vector<8x32xbf16>, vector<32x64xbf16>, vector<8x64xf32> -> vector<8x64xf32>
    %c0_4 = arith.constant 0 : index
    %c0_5 = arith.constant 0 : index
    %4 = vector.load %arg4[%c0_4, %c0_5] : memref<8x8xf32, #tpu.memory_space<vmem>>, vector<8x8xf32>
    %c0_6 = arith.constant 0 : index
    %c0_7 = arith.constant 0 : index
    %5 = vector.load %arg5[%c0_6, %c0_7] : memref<8x8xf32, #tpu.memory_space<vmem>>, vector<8x8xf32>
    %6 = vector.extract_strided_slice %3 {offsets = [0, 0], sizes = [8, 8], strides = [1, 1]} : vector<8x64xf32> to vector<8x8xf32>
    %7 = vector.extract_strided_slice %3 {offsets = [0, 32], sizes = [8, 8], strides = [1, 1]} : vector<8x64xf32> to vector<8x8xf32>
    %8 = vector.extract_strided_slice %6 {offsets = [0, 4], sizes = [8, 4], strides = [1, 1]} : vector<8x8xf32> to vector<8x4xf32>
    %cst_8 = arith.constant 0.000000e+00 : f32
    %9 = vector.broadcast %cst_8 : f32 to vector<8x4xf32>
    %10 = arith.subf %9, %8 : vector<8x4xf32>
    %11 = vector.extract_strided_slice %6 {offsets = [0, 0], sizes = [8, 4], strides = [1, 1]} : vector<8x8xf32> to vector<8x4xf32>
    %12 = tpu.concatenate %10, %11 in 1 : vector<8x4xf32>, vector<8x4xf32> -> vector<8x8xf32>
    %13 = arith.mulf %6, %4 : vector<8x8xf32>
    %14 = arith.mulf %12, %5 : vector<8x8xf32>
    %15 = arith.addf %13, %14 : vector<8x8xf32>
    %16 = tpu.transpose %15, [1, 0] : vector<8x8xf32> -> vector<8x8xf32>
    %17 = arith.truncf %16 : vector<8x8xf32> to vector<8x8xbf16>
    %c0_9 = arith.constant 0 : index
    %c0_10 = arith.constant 0 : index
    %c0_11 = arith.constant 0 : index
    %c0_12 = arith.constant 0 : index
    %18 = vector.load %arg6[%c0_9, %c0_10, %c0_11, %c0_12] : memref<1x8x8x8xbf16, #tpu.memory_space<vmem>>, vector<1x1x8x8xbf16>
    %19 = vector.shape_cast %18 : vector<1x1x8x8xbf16> to vector<8x8xbf16>
    %20 = vector.shape_cast %17 : vector<8x8xbf16> to vector<1x1x8x8xbf16>
    tpu.vector_store %arg6[%c0_9, %c0_10, %c0_11, %c0_12], %20 {strides = array<i32>} : memref<1x8x8x8xbf16, #tpu.memory_space<vmem>>, vector<1x1x8x8xbf16>,
    %21 = tpu.transpose %6, [1, 0] : vector<8x8xf32> -> vector<8x8xf32>
    %22 = arith.truncf %21 : vector<8x8xf32> to vector<8x8xbf16>
    %c0_13 = arith.constant 0 : index
    %c4 = arith.constant 4 : index
    %c0_14 = arith.constant 0 : index
    %c0_15 = arith.constant 0 : index
    %23 = vector.load %arg6[%c0_13, %c4, %c0_14, %c0_15] : memref<1x8x8x8xbf16, #tpu.memory_space<vmem>>, vector<1x1x8x8xbf16>
    %24 = vector.shape_cast %23 : vector<1x1x8x8xbf16> to vector<8x8xbf16>
    %25 = vector.shape_cast %22 : vector<8x8xbf16> to vector<1x1x8x8xbf16>
    tpu.vector_store %arg6[%c0_13, %c4, %c0_14, %c0_15], %25 {strides = array<i32>} : memref<1x8x8x8xbf16, #tpu.memory_space<vmem>>, vector<1x1x8x8xbf16>,
    %26 = tpu.transpose %7, [1, 0] : vector<8x8xf32> -> vector<8x8xf32>
    %27 = arith.truncf %26 : vector<8x8xf32> to vector<8x8xbf16>
    %c0_16 = arith.constant 0 : index
    %c0_17 = arith.constant 0 : index
    %c0_18 = arith.constant 0 : index
    %c0_19 = arith.constant 0 : index
    %28 = vector.load %arg7[%c0_16, %c0_17, %c0_18, %c0_19] : memref<1x4x8x8xbf16, #tpu.memory_space<vmem>>, vector<1x1x8x8xbf16>
    %29 = vector.shape_cast %28 : vector<1x1x8x8xbf16> to vector<8x8xbf16>
    %30 = vector.shape_cast %27 : vector<8x8xbf16> to vector<1x1x8x8xbf16>
    tpu.vector_store %arg7[%c0_16, %c0_17, %c0_18, %c0_19], %30 {strides = array<i32>} : memref<1x4x8x8xbf16, #tpu.memory_space<vmem>>, vector<1x1x8x8xbf16>,
    %31 = vector.extract_strided_slice %3 {offsets = [0, 8], sizes = [8, 8], strides = [1, 1]} : vector<8x64xf32> to vector<8x8xf32>
    %32 = vector.extract_strided_slice %3 {offsets = [0, 40], sizes = [8, 8], strides = [1, 1]} : vector<8x64xf32> to vector<8x8xf32>
    %33 = vector.extract_strided_slice %31 {offsets = [0, 4], sizes = [8, 4], strides = [1, 1]} : vector<8x8xf32> to vector<8x4xf32>
    %cst_20 = arith.constant 0.000000e+00 : f32
    %34 = vector.broadcast %cst_20 : f32 to vector<8x4xf32>
    %35 = arith.subf %34, %33 : vector<8x4xf32>
    %36 = vector.extract_strided_slice %31 {offsets = [0, 0], sizes = [8, 4], strides = [1, 1]} : vector<8x8xf32> to vector<8x4xf32>
    %37 = tpu.concatenate %35, %36 in 1 : vector<8x4xf32>, vector<8x4xf32> -> vector<8x8xf32>
    %38 = arith.mulf %31, %4 : vector<8x8xf32>
    %39 = arith.mulf %37, %5 : vector<8x8xf32>
    %40 = arith.addf %38, %39 : vector<8x8xf32>
    %41 = tpu.transpose %40, [1, 0] : vector<8x8xf32> -> vector<8x8xf32>
    %42 = arith.truncf %41 : vector<8x8xf32> to vector<8x8xbf16>
    %c0_21 = arith.constant 0 : index
    %c1 = arith.constant 1 : index
    %c0_22 = arith.constant 0 : index
    %c0_23 = arith.constant 0 : index
    %43 = vector.load %arg6[%c0_21, %c1, %c0_22, %c0_23] : memref<1x8x8x8xbf16, #tpu.memory_space<vmem>>, vector<1x1x8x8xbf16>
    %44 = vector.shape_cast %43 : vector<1x1x8x8xbf16> to vector<8x8xbf16>
    %45 = vector.shape_cast %42 : vector<8x8xbf16> to vector<1x1x8x8xbf16>
    tpu.vector_store %arg6[%c0_21, %c1, %c0_22, %c0_23], %45 {strides = array<i32>} : memref<1x8x8x8xbf16, #tpu.memory_space<vmem>>, vector<1x1x8x8xbf16>,
    %46 = tpu.transpose %31, [1, 0] : vector<8x8xf32> -> vector<8x8xf32>
    %47 = arith.truncf %46 : vector<8x8xf32> to vector<8x8xbf16>
    %c0_24 = arith.constant 0 : index
    %c5 = arith.constant 5 : index
    %c0_25 = arith.constant 0 : index
    %c0_26 = arith.constant 0 : index
    %48 = vector.load %arg6[%c0_24, %c5, %c0_25, %c0_26] : memref<1x8x8x8xbf16, #tpu.memory_space<vmem>>, vector<1x1x8x8xbf16>
    %49 = vector.shape_cast %48 : vector<1x1x8x8xbf16> to vector<8x8xbf16>
    %50 = vector.shape_cast %47 : vector<8x8xbf16> to vector<1x1x8x8xbf16>
    tpu.vector_store %arg6[%c0_24, %c5, %c0_25, %c0_26], %50 {strides = array<i32>} : memref<1x8x8x8xbf16, #tpu.memory_space<vmem>>, vector<1x1x8x8xbf16>,
    %51 = tpu.transpose %32, [1, 0] : vector<8x8xf32> -> vector<8x8xf32>
    %52 = arith.truncf %51 : vector<8x8xf32> to vector<8x8xbf16>
    %c0_27 = arith.constant 0 : index
    %c1_28 = arith.constant 1 : index
    %c0_29 = arith.constant 0 : index
    %c0_30 = arith.constant 0 : index
    %53 = vector.load %arg7[%c0_27, %c1_28, %c0_29, %c0_30] : memref<1x4x8x8xbf16, #tpu.memory_space<vmem>>, vector<1x1x8x8xbf16>
    %54 = vector.shape_cast %53 : vector<1x1x8x8xbf16> to vector<8x8xbf16>
    %55 = vector.shape_cast %52 : vector<8x8xbf16> to vector<1x1x8x8xbf16>
    tpu.vector_store %arg7[%c0_27, %c1_28, %c0_29, %c0_30], %55 {strides = array<i32>} : memref<1x4x8x8xbf16, #tpu.memory_space<vmem>>, vector<1x1x8x8xbf16>,
    %56 = vector.extract_strided_slice %3 {offsets = [0, 16], sizes = [8, 8], strides = [1, 1]} : vector<8x64xf32> to vector<8x8xf32>
    %57 = vector.extract_strided_slice %3 {offsets = [0, 48], sizes = [8, 8], strides = [1, 1]} : vector<8x64xf32> to vector<8x8xf32>
    %58 = vector.extract_strided_slice %56 {offsets = [0, 4], sizes = [8, 4], strides = [1, 1]} : vector<8x8xf32> to vector<8x4xf32>
    %cst_31 = arith.constant 0.000000e+00 : f32
    %59 = vector.broadcast %cst_31 : f32 to vector<8x4xf32>
    %60 = arith.subf %59, %58 : vector<8x4xf32>
    %61 = vector.extract_strided_slice %56 {offsets = [0, 0], sizes = [8, 4], strides = [1, 1]} : vector<8x8xf32> to vector<8x4xf32>
    %62 = tpu.concatenate %60, %61 in 1 : vector<8x4xf32>, vector<8x4xf32> -> vector<8x8xf32>
    %63 = arith.mulf %56, %4 : vector<8x8xf32>
    %64 = arith.mulf %62, %5 : vector<8x8xf32>
    %65 = arith.addf %63, %64 : vector<8x8xf32>
    %66 = tpu.transpose %65, [1, 0] : vector<8x8xf32> -> vector<8x8xf32>
    %67 = arith.truncf %66 : vector<8x8xf32> to vector<8x8xbf16>
    %c0_32 = arith.constant 0 : index
    %c2 = arith.constant 2 : index
    %c0_33 = arith.constant 0 : index
    %c0_34 = arith.constant 0 : index
    %68 = vector.load %arg6[%c0_32, %c2, %c0_33, %c0_34] : memref<1x8x8x8xbf16, #tpu.memory_space<vmem>>, vector<1x1x8x8xbf16>
    %69 = vector.shape_cast %68 : vector<1x1x8x8xbf16> to vector<8x8xbf16>
    %70 = vector.shape_cast %67 : vector<8x8xbf16> to vector<1x1x8x8xbf16>
    tpu.vector_store %arg6[%c0_32, %c2, %c0_33, %c0_34], %70 {strides = array<i32>} : memref<1x8x8x8xbf16, #tpu.memory_space<vmem>>, vector<1x1x8x8xbf16>,
    %71 = tpu.transpose %56, [1, 0] : vector<8x8xf32> -> vector<8x8xf32>
    %72 = arith.truncf %71 : vector<8x8xf32> to vector<8x8xbf16>
    %c0_35 = arith.constant 0 : index
    %c6 = arith.constant 6 : index
    %c0_36 = arith.constant 0 : index
    %c0_37 = arith.constant 0 : index
    %73 = vector.load %arg6[%c0_35, %c6, %c0_36, %c0_37] : memref<1x8x8x8xbf16, #tpu.memory_space<vmem>>, vector<1x1x8x8xbf16>
    %74 = vector.shape_cast %73 : vector<1x1x8x8xbf16> to vector<8x8xbf16>
    %75 = vector.shape_cast %72 : vector<8x8xbf16> to vector<1x1x8x8xbf16>
    tpu.vector_store %arg6[%c0_35, %c6, %c0_36, %c0_37], %75 {strides = array<i32>} : memref<1x8x8x8xbf16, #tpu.memory_space<vmem>>, vector<1x1x8x8xbf16>,
    %76 = tpu.transpose %57, [1, 0] : vector<8x8xf32> -> vector<8x8xf32>
    %77 = arith.truncf %76 : vector<8x8xf32> to vector<8x8xbf16>
    %c0_38 = arith.constant 0 : index
    %c2_39 = arith.constant 2 : index
    %c0_40 = arith.constant 0 : index
    %c0_41 = arith.constant 0 : index
    %78 = vector.load %arg7[%c0_38, %c2_39, %c0_40, %c0_41] : memref<1x4x8x8xbf16, #tpu.memory_space<vmem>>, vector<1x1x8x8xbf16>
    %79 = vector.shape_cast %78 : vector<1x1x8x8xbf16> to vector<8x8xbf16>
    %80 = vector.shape_cast %77 : vector<8x8xbf16> to vector<1x1x8x8xbf16>
    tpu.vector_store %arg7[%c0_38, %c2_39, %c0_40, %c0_41], %80 {strides = array<i32>} : memref<1x4x8x8xbf16, #tpu.memory_space<vmem>>, vector<1x1x8x8xbf16>,
    %81 = vector.extract_strided_slice %3 {offsets = [0, 24], sizes = [8, 8], strides = [1, 1]} : vector<8x64xf32> to vector<8x8xf32>
    %82 = vector.extract_strided_slice %3 {offsets = [0, 56], sizes = [8, 8], strides = [1, 1]} : vector<8x64xf32> to vector<8x8xf32>
    %83 = vector.extract_strided_slice %81 {offsets = [0, 4], sizes = [8, 4], strides = [1, 1]} : vector<8x8xf32> to vector<8x4xf32>
    %cst_42 = arith.constant 0.000000e+00 : f32
    %84 = vector.broadcast %cst_42 : f32 to vector<8x4xf32>
    %85 = arith.subf %84, %83 : vector<8x4xf32>
    %86 = vector.extract_strided_slice %81 {offsets = [0, 0], sizes = [8, 4], strides = [1, 1]} : vector<8x8xf32> to vector<8x4xf32>
    %87 = tpu.concatenate %85, %86 in 1 : vector<8x4xf32>, vector<8x4xf32> -> vector<8x8xf32>
    %88 = arith.mulf %81, %4 : vector<8x8xf32>
    %89 = arith.mulf %87, %5 : vector<8x8xf32>
    %90 = arith.addf %88, %89 : vector<8x8xf32>
    %91 = tpu.transpose %90, [1, 0] : vector<8x8xf32> -> vector<8x8xf32>
    %92 = arith.truncf %91 : vector<8x8xf32> to vector<8x8xbf16>
    %c0_43 = arith.constant 0 : index
    %c3 = arith.constant 3 : index
    %c0_44 = arith.constant 0 : index
    %c0_45 = arith.constant 0 : index
    %93 = vector.load %arg6[%c0_43, %c3, %c0_44, %c0_45] : memref<1x8x8x8xbf16, #tpu.memory_space<vmem>>, vector<1x1x8x8xbf16>
    %94 = vector.shape_cast %93 : vector<1x1x8x8xbf16> to vector<8x8xbf16>
    %95 = vector.shape_cast %92 : vector<8x8xbf16> to vector<1x1x8x8xbf16>
    tpu.vector_store %arg6[%c0_43, %c3, %c0_44, %c0_45], %95 {strides = array<i32>} : memref<1x8x8x8xbf16, #tpu.memory_space<vmem>>, vector<1x1x8x8xbf16>,
    %96 = tpu.transpose %81, [1, 0] : vector<8x8xf32> -> vector<8x8xf32>
    %97 = arith.truncf %96 : vector<8x8xf32> to vector<8x8xbf16>
    %c0_46 = arith.constant 0 : index
    %c7 = arith.constant 7 : index
    %c0_47 = arith.constant 0 : index
    %c0_48 = arith.constant 0 : index
    %98 = vector.load %arg6[%c0_46, %c7, %c0_47, %c0_48] : memref<1x8x8x8xbf16, #tpu.memory_space<vmem>>, vector<1x1x8x8xbf16>
    %99 = vector.shape_cast %98 : vector<1x1x8x8xbf16> to vector<8x8xbf16>
    %100 = vector.shape_cast %97 : vector<8x8xbf16> to vector<1x1x8x8xbf16>
    tpu.vector_store %arg6[%c0_46, %c7, %c0_47, %c0_48], %100 {strides = array<i32>} : memref<1x8x8x8xbf16, #tpu.memory_space<vmem>>, vector<1x1x8x8xbf16>,
    %101 = tpu.transpose %82, [1, 0] : vector<8x8xf32> -> vector<8x8xf32>
    %102 = arith.truncf %101 : vector<8x8xf32> to vector<8x8xbf16>
    %c0_49 = arith.constant 0 : index
    %c3_50 = arith.constant 3 : index
    %c0_51 = arith.constant 0 : index
    %c0_52 = arith.constant 0 : index
    %103 = vector.load %arg7[%c0_49, %c3_50, %c0_51, %c0_52] : memref<1x4x8x8xbf16, #tpu.memory_space<vmem>>, vector<1x1x8x8xbf16>
    %104 = vector.shape_cast %103 : vector<1x1x8x8xbf16> to vector<8x8xbf16>
    %105 = vector.shape_cast %102 : vector<8x8xbf16> to vector<1x1x8x8xbf16>
    tpu.vector_store %arg7[%c0_49, %c3_50, %c0_51, %c0_52], %105 {strides = array<i32>} : memref<1x4x8x8xbf16, #tpu.memory_space<vmem>>, vector<1x1x8x8xbf16>,
    return
  }
  func.func @transform_0(%arg0: i32, %arg1: i32) -> (i32, i32, i32) {
    %c0_i32 = arith.constant 0 : i32
    %c0_i32_0 = arith.constant 0 : i32
    return %arg0, %arg1, %c0_i32 : i32, i32, i32
  }
  func.func @transform_1(%arg0: i32, %arg1: i32) -> (i32, i32) {
    %c0_i32 = arith.constant 0 : i32
    %c0_i32_0 = arith.constant 0 : i32
    %c0_i32_1 = arith.constant 0 : i32
    return %c0_i32, %c0_i32_0 : i32, i32
  }
  func.func @transform_2(%arg0: i32, %arg1: i32) -> (i32, i32) {
    %c0_i32 = arith.constant 0 : i32
    %c0_i32_0 = arith.constant 0 : i32
    return %arg1, %c0_i32 : i32, i32
  }
  func.func @transform_3(%arg0: i32, %arg1: i32) -> (i32, i32) {
    %c0_i32 = arith.constant 0 : i32
    %c0_i32_0 = arith.constant 0 : i32
    return %arg1, %c0_i32 : i32, i32
  }
  func.func @transform_4(%arg0: i32, %arg1: i32) -> (i32, i32, i32, i32) {
    %c0_i32 = arith.constant 0 : i32
    %c0_i32_0 = arith.constant 0 : i32
    %c0_i32_1 = arith.constant 0 : i32
    return %arg0, %c0_i32, %c0_i32_0, %arg1 : i32, i32, i32, i32
  }
  func.func @transform_5(%arg0: i32, %arg1: i32) -> (i32, i32, i32, i32) {
    %c0_i32 = arith.constant 0 : i32
    %c0_i32_0 = arith.constant 0 : i32
    %c0_i32_1 = arith.constant 0 : i32
    return %arg0, %c0_i32, %c0_i32_0, %arg1 : i32, i32, i32, i32
  }
}

</mosaic_0001>

<bundles_post_ra>
// kernel: tpu_custom_call.1
= control target key start
LH: loop header
LB: loop body
LE: loop exit
PB: predicated region body
PF: predicated region fallthrough
CT: control target
= control target key end

     0   :  { %11 = vsyncpa [#allocation3], 0  ;;  %s1956_s0 = inlined_call_operand.hbm [shape: bf16[2,8,32], index: 0, kind: input, shape index: {}]   ;;  %s1957_s1 = inlined_call_operand.hbm [shape: bf16[32,64], index: 1, kind: input, shape index: {}]   ;;  %s1958_s2 = inlined_call_operand.hbm [shape: f32[8,8], index: 2, kind: input, shape index: {}]   ;;  %s1959_s3 = inlined_call_operand.hbm [shape: f32[8,8], index: 3, kind: input, shape index: {}]   ;;  %s1960_s4 = inlined_call_operand.hbm [shape: bf16[2,8,8,8], index: 4, kind: output, shape index: {0}]   ;;  %s1961_s5 = inlined_call_operand.hbm [shape: bf16[2,4,8,8], index: 5, kind: output, shape index: {1}]  }
   0x1   :  { %13 = vsyncpa [#allocation3 + $0x1], 0 }
   0x2   :  { %14 = vsyncpa [#allocation6], 0 }
   0x3   :  { %15 = vsyncpa [#allocation9], 0 }
   0x4   :  { %16 = vsyncpa [#allocation4], 0 }
   0x5   :  { %18 = vsyncpa [#allocation4 + $0x1], 0 }
   0x6   :  { %19 = vsyncpa [#allocation12], 0 }
   0x7   :  { %21 = vsyncpa [#allocation12 + $0x1], 0  ;;  %s1601_s18 = smov 0   ;;  %s1603_s19 = smov 0  }
   0x8   :  { %s1605_s20 = smov 0   ;;  %s1607_s21 = smov 0  }
   0x9   :  { %s1609_s22 = smov 0   ;;  %s1611_s23 = smov 0  }
   0xa LB: > { %1968 = sst [smem:[#allocation18_spill]] %s1523_s18  ;;  %s1094_s24 = sadd.s32 4294967295, %s1543_s23   ;;  %s1543_s23 = sphi %s1611_s23, %s27_s23   ;;  %s1539_s22 = sphi %s1609_s22, %s1991_s22   ;;  %s1535_s21 = sphi %s1607_s21, %s1990_s21   ;;  %s1531_s20 = sphi %s1605_s20, %s1989_s20   ;;  %s1527_s19 = sphi %s1603_s19, %s1988_s19   ;;  %s1523_s18 = sphi %s1601_s18, %s1987_s18  }
   0xb   : > { %s1095_s25 = sadd.s32 4294967294, %s1543_s23   ;;  %p61_p0 = scmp.ne.s32.totalorder %s1527_s19, %s1523_s18 }
   0xc   : > { %p1635_p1 = scmp.eq.s32.totalorder %s1094_s24, 0  ;;  %p1639_p2 = scmp.eq.s32.totalorder %s1094_s24, 1 }
   0xd   : > { %p166_p3 = scmp.eq.s32.totalorder %s1095_s25, 1  ;;  %p1096_p5 = scmp.ge.s32.totalorder %s1543_s23, 1 }
   0xe   : > { %s1969_s26 = scalar_select %p1635_p1, 1, 0 }
   0xf   : > { %s1970_s27 = scalar_select %p1639_p2, 1, 0 }
  0x10   : > { %p1645_p4 = por %p1635_p1, %p61_p0  ;;  %p1650_p6 = por %p166_p3, %p61_p0 }
  0x11   : > { %p201_p7 = scmp.lt.s32.totalorder %s1543_s23, 3  ;;  %s1545_s6 = smov [#allocation5]  }
  0x12   : > { %s1971_s28 = scalar_select %p1645_p4, 1, 0 }
  0x13   : > { %s1972_s29 = scalar_select %p1650_p6, 1, 0 }
  0x14   : > { %p1655_p8 = pnand %p1096_p5, %p201_p7  ;;  %s213_s7 = sshll.u32 %s1545_s6, 4  ;;  %s1659_s7 = int_to_ptr.vmem [resolvable:$true] %s213_s7 }
  0x15   : > { %1973 = sst [smem:[#allocation19_spill]] %s1972_s29  ;;  %s1546_s9 = smov [#allocation7]  }
  0x16   : > { %s1974_s30 = scalar_select %p1655_p8, 1, 0 }
  0x17   : > { %p1162_p9 = pneg %p1655_p8  ;;  %s229_s10 = sshll.u32 %s1546_s9, 4  ;;  %s1670_s10 = int_to_ptr.vmem [resolvable:$true] %s229_s10 }
  0x18   : > { %s1547_s11 = smov [#allocation8]   ;;  %s1307_s15 = scalar_lea.hbm %s1957_s1, 256 }
  0x19   : > { %p1666_p11 = pnand %p1162_p9, %p1635_p1  ;;  %s1672_s12 = sshll.u32 %s1547_s11, 4  ;;  %s243_s12 = int_to_ptr.vmem [resolvable:$true] %s1672_s12 }
  0x1a   : > { %p1308_p12 = scmp.ne.s32.totalorder %s1957_s1, %s1307_s15  ;;  %p1314_p5 = scmp.lt.u32.totalorder %s1307_s15, %s1957_s1 }
  0x1b   : > { %p1682_p13 = pneg %p1666_p11 }
  0x1d   : > { %p1310_p0 = pnand %p1682_p13, %p1308_p12 }
  0x1f   : > { %p1311_p3 = pneg %p1310_p0 }
  0x21   : > { %p1316_p7 = pnand %p1314_p5, %p1311_p3 }
  0x23   : > { %1319 = shalt.err (!%p1316_p7)
}
  0x24   : > { %s1320_s9 = scalar_lea.vmem %s1659_s7, 256  ;;  %p1328_p1 = scmp.lt.s32.totalorder %s1659_s7, %s1659_s7 }
  0x25   : > { %p1321_p9 = scmp.ne.s32.totalorder %s1659_s7, %s1320_s9  ;;  %p1329_p4 = scmp.lt.s32.totalorder %s1320_s9, %s1320_s9 }
  0x27   : > { %p1323_p10 = pnand %p1321_p9, %p1682_p13  ;;  %p1330_p12 = por %p1329_p4, %p1328_p1 }
  0x29   : > { %p1324_p6 = pneg %p1323_p10 }
  0x2b   : > { %p1331_p0 = pnand %p1330_p12, %p1324_p6 }
  0x2d   : > { %1334 = shalt.err (!%p1331_p0)
}
  0x2e   : > { %s1548_s11 = smov 64   ;;  %s1549_s13 = smov 4  }
  0x2f   : > { %1165 = dma.hbm_to_vmem [thread:$0]  (!%p1666_p11), %s1957_s1, 256, %s1659_s7, [#allocation6], %s1548_s11, %s1548_s11, %s1549_s13  }
  0x30   : > { %s1335_s25 = scalar_lea.hbm %s1958_s2, 128 }
  0x31   : > { %p1336_p1 = scmp.ne.s32.totalorder %s1958_s2, %s1335_s25  ;;  %p1342_p10 = scmp.lt.u32.totalorder %s1335_s25, %s1958_s2 }
  0x33   : > { %p1338_p4 = pnand %p1336_p1, %p1682_p13 }
  0x35   : > { %p1339_p6 = pneg %p1338_p4 }
  0x37   : > { %p1344_p3 = pnand %p1342_p10, %p1339_p6 }
  0x39   : > { %1347 = shalt.err (!%p1344_p3)
}
  0x3a   : > { %s1348_s7 = scalar_lea.vmem %s1670_s10, 128  ;;  %p1356_p12 = scmp.lt.s32.totalorder %s1670_s10, %s1670_s10 }
  0x3b   : > { %p1349_p5 = scmp.ne.s32.totalorder %s1670_s10, %s1348_s7  ;;  %p1357_p0 = scmp.lt.s32.totalorder %s1348_s7, %s1348_s7 }
  0x3d   : > { %p1351_p7 = pnand %p1349_p5, %p1682_p13  ;;  %p1358_p1 = por %p1357_p0, %p1356_p12 }
  0x3f   : > { %p1352_p9 = pneg %p1351_p7 }
  0x41   : > { %p1359_p4 = pnand %p1358_p1, %p1352_p9 }
  0x43   : > { %1362 = shalt.err (!%p1359_p4)
}
  0x44   : > { %1168 = dma.hbm_to_vmem [thread:$0]  (!%p1666_p11), %s1958_s2, 128, %s1670_s10, [#allocation6]  }
  0x45   : > { %s1363_s14 = scalar_lea.hbm %s1959_s3, 128 }
  0x46   : > { %p1364_p6 = scmp.ne.s32.totalorder %s1959_s3, %s1363_s14  ;;  %p1370_p5 = scmp.lt.u32.totalorder %s1363_s14, %s1959_s3 }
  0x48   : > { %p1366_p10 = pnand %p1364_p6, %p1682_p13 }
  0x4a   : > { %p1367_p3 = pneg %p1366_p10 }
  0x4c   : > { %p1372_p7 = pnand %p1370_p5, %p1367_p3 }
  0x4e   : > { %1375 = shalt.err (!%p1372_p7)
}
  0x4f   : > { %s1376_s6 = scalar_lea.vmem %s243_s12, 128  ;;  %p1384_p1 = scmp.lt.s32.totalorder %s243_s12, %s243_s12 }
  0x50   : > { %p1377_p9 = scmp.ne.s32.totalorder %s243_s12, %s1376_s6  ;;  %p1385_p4 = scmp.lt.s32.totalorder %s1376_s6, %s1376_s6 }
  0x52   : > { %p1379_p12 = pnand %p1377_p9, %p1682_p13  ;;  %p1386_p8 = por %p1385_p4, %p1384_p1 }
  0x54   : > { %p1380_p0 = pneg %p1379_p12 }
  0x56   : > { %p1387_p2 = pnand %p1386_p8, %p1380_p0 }
  0x58   : > { %1390 = shalt.err (!%p1387_p2)
}
  0x59   : > { %1171 = dma.hbm_to_vmem [thread:$0]  (!%p1666_p11), %s1959_s3, 128, %s243_s12, [#allocation9]  }
  0x5a   : > { %s48_s24 = sadd.s32 1, %s1531_s20  ;;  %s39_s7 = sadd.s32 1, %s1539_s22 }
  0x5b   : > { %p55_p2 = scmp.ne.s32.totalorder %s1531_s20, %s1527_s19  ;;  %p41_p8 = scmp.ge.s32.totalorder %s39_s7, 2 }
  0x5c   : > { %p56_p13 = scmp.eq.s32.totalorder %s1543_s23, 0  ;;  %p1977_p6 = scmp.ne.s32.totalorder %s1970_s27, 0 }
  0x5d   : > { %p1186_p3 = scmp.lt.s32.totalorder %s1543_s23, 2  ;;  %s1993_s7 = smov (%p41_p8, %s39_s7), 0 }
  0x5e   : > { %p1752_p10 = por %p1977_p6, %p55_p2  ;;  %p57_p5 = por %p56_p13, %p55_p2 }
  0x5f   : > { %s253_s18 = sand.u32 1, %s1531_s20   ;;  %s43_s29 = ssub.s32 %s1539_s22, %s1993_s7 }
  0x60   : > { %p46_p7 = scmp.eq.s32.totalorder %s43_s29, 0  ;;  %s1101_s12 = sshll.u32 %s253_s18, 2 }
  0x61   : > { %s1102_s11 = sshll.u32 %s1539_s22, 6  ;;  %s257_s16 = scalar_lea.vmem [#allocation2], %s1101_s12 }
  0x62   : > { %s1764_s13 = scalar_select %p46_p7, %s1531_s20, %s48_s24  }
  0x63   : > { %s1769_s27 = scalar_lea.hbm %s1956_s0, %s1102_s11  ;;  %s265_s17 = sshll.u32 %s257_s16, 4  ;;  %s1771_s17 = int_to_ptr.vmem [resolvable:$true] %s265_s17 }
  0x64   : > { %p1775_p11 = pnand %p1186_p3, %p57_p5  ;;  %s254_s6 = scalar_lea.sflag [#allocation3], %s253_s18 }
  0x65   : > { %s1391_s10 = scalar_lea.hbm %s1769_s27, 64  ;;  %s1396_s29 = scalar_lea.hbm %s1956_s0, 128 }
  0x66   : > { %p1392_p9 = scmp.ne.s32.totalorder %s1769_s27, %s1391_s10  ;;  %p1393_p12 = pneg %p1775_p11 }
  0x67   : > { %p1397_p4 = scmp.lt.u32.totalorder %s1769_s27, %s1956_s0  ;;  %p1398_p2 = scmp.lt.u32.totalorder %s1396_s29, %s1391_s10 }
  0x68   : > { %p1394_p0 = pnand %p1393_p12, %p1392_p9  ;;  %p1400_p13 = scmp.lt.u32.totalorder %s1391_s10, %s1769_s27 }
  0x69   : > { %p1399_p8 = por %p1398_p2, %p1397_p4 }
  0x6a   : > { %p1395_p1 = pneg %p1394_p0 }
  0x6b   : > { %p1401_p6 = por %p1400_p13, %p1399_p8 }
  0x6d   : > { %p1402_p3 = pnand %p1401_p6, %p1395_p1 }
  0x6f   : > { %1405 = shalt.err (!%p1402_p3)
}
  0x70   : > { %s1406_s18 = scalar_lea.vmem %s1771_s17, 64  ;;  %s1550_s14 = smov [#allocation2]  }
  0x71   : > { %p1407_p5 = scmp.ne.s32.totalorder %s1771_s17, %s1406_s18  ;;  %s1411_s15 = sshll.u32 %s1550_s14, 4  ;;  %s1412_s15 = int_to_ptr.vmem [resolvable:$false] %s1411_s15 }
  0x72   : > { %s1413_s16 = scalar_lea.vmem %s1412_s15, 128  ;;  %p1414_p0 = scmp.lt.s32.totalorder %s1771_s17, %s1412_s15 }
  0x73   : > { %p1409_p7 = pnand %p1407_p5, %p1393_p12  ;;  %p1415_p4 = scmp.lt.s32.totalorder %s1413_s16, %s1406_s18 }
  0x75   : > { %p1410_p9 = pneg %p1409_p7  ;;  %p1416_p2 = por %p1415_p4, %p1414_p0 }
  0x77   : > { %p1417_p8 = pnand %p1416_p2, %p1410_p9 }
  0x79   : > { %1420 = shalt.err (!%p1417_p8)
}
  0x7a   : > { %1175 = dma.hbm_to_vmem [thread:$0]  (!%p1775_p11), %s1769_s27, 64, %s1771_s17, %s254_s6  }
  0x7b   : > { %p1980_p1 = scmp.ne.s32.totalorder %s1974_s30, 0 }
  0x7c   : > { %s1807_s10 = sand.u32 (!%p1980_p1), 1, %s1527_s19   ;;  %p1981_p12 = scmp.ne.s32.totalorder (!%p1980_p1), %s1971_s28, 0 }
  0x7d   : > { %274 = sbr.rel (%p1980_p1) target bundleno = 874 (0x36a), region = 36  ;;  %s1104_s9 = sshll.u32 (!%p1980_p1), %s1807_s10, 2 }
  0x7e   : > { %s277_s24 = scalar_lea.sflag (!%p1980_p1), [#allocation3], %s1807_s10  ;;  %s280_s29 = scalar_lea.vmem (!%p1980_p1), [#allocation2], %s1104_s9 }
  0x84   : > { %1502 = dma.done.wait (%p1981_p12), %s277_s24, 64  }
  0x85   : > { %1504 = vsyncadd (%p1981_p12), %s277_s24, 4294967232  ;;  %p1982_p13 = scmp.ne.s32.totalorder %s1969_s26, 0 }
  0x87   : > { %1506 = dma.done.wait (%p1982_p13), [#allocation6], 384  }
  0x88   : > { %1508 = vsyncadd (%p1982_p13), [#allocation6], 4294966912 }
  0x89   : > { %1510 = dma.done.wait (%p1982_p13), [#allocation9], 128  }
  0x8a   : > { %1512 = vsyncadd (%p1982_p13), [#allocation9], 4294967168  ;;  %v1551_v0 = vmov 0.0   ;;  %vm1552_vm0 = vmmov 0   ;;  %v1305_v1 = vld [vmem:[#allocation5] sm:$0xff]   ;;  %v1306_v2 = vld [vmem:[#allocation5 + $0x8] sm:$0xff]  }
  0x8b   : > { %1136 = vmatprep.subr.bf16.mxu0 %v1551_v0  ;;  %1140 = vmatprep.mubr.msk.bf16.mxu0 %vm1552_vm0, %v1551_v0  ;;  %v386_v3 = vld [vmem:[#allocation7] sm:$0xff]  ;;  %s1553_s28 = smov 8   ;;  %v325_v4 = vld [vmem:[%s280_s29] sm:$0xf]  ;;  %vm342_vm1 = vcmask 261120   ;;  %s1554_s26 = smov 96  }
  0x8c   : > { %1137 = vmatpush3.bf16.msra.mxu0 %v1305_v1  ;;  %517 = vrot.lane.b32.xlu1 %v386_v3, %s1553_s28  ;;  %s1555_s30 = smov 4   ;;  %s1556_s27 = smov 124   ;;  %vm397_vm2 = vcmask 31744   ;;  %v387_v13 = vld [vmem:[#allocation8] sm:$0xff]  ;;  %vm435_vm3 = vcmask 60416  }
  0x8d   : > { %1138 = vmatprep.subr.bf16.mxu0 %v1551_v0  ;;  %s1557_s17 = smov 116   ;;  %s1558_s25 = smov 88  }
  0x8e   : > { %s1559_s6 = smov 108   ;;  %s1560_s12 = smov 100  }
  0x8f   : > { %s1561_s11 = smov 16   ;;  %s1562_s18 = smov 24  }
  0x90   : > { %1139 = vmatpush3.bf16.msra.mxu0 %v1306_v2  ;;  %s1563_s14 = smov 80   ;;  %s1564_s15 = smov 72  }
  0x91   : > { %s1565_s16 = smov 120   ;;  %s1566_s9 = smov 112  }
  0x92   : > { %s1567_s24 = smov 104   ;;  %s1109_s29 = sshll.u32 %s1807_s10, 4 }
  0x93   : > { %1141 = vmatmul.mubr.msk.bf16.vlgmr.msra.gmra.mrb[0].mxu0 %vm342_vm1, %v325_v4 }
  0xfe   : > { %v518_v10 = vpop.permute.xlu1 %517 }
 0x166   : > { %v1824_v5 = vpop.f32.mrb[0].mxu0 }
 0x167   : > { %472 = vrot.lane.b32.xlu1 %v1824_v5, %s1554_s26  ;;  %394 = vrot.lane.b32.xlu0 %v1824_v5, %s1555_s30  ;;  %v1142_v6 = vpop.f32.mrb[1].mxu0  ;;  %v388_v9 = vsub.f32 0.0, %v1824_v5  ;;  %v399_v30 = vmul.f32 %v386_v3, %v1824_v5  ;;  %v520_v34 = vmul.f32 %v518_v10, %v1824_v5 }
 0x168   : > { %v383_v7 = vpop.f32.mrb[2].mxu0 }
 0x169   : > { %v1143_v8 = vpop.f32.mrb[3].mxu0 }
 0x16b   : > { %512 = vrot.lane.b32.xlu0 %v1824_v5, %s1556_s27  ;;  %509 = vrot.lane.b32.xlu1 %v388_v9, %s1557_s17 }
 0x16f   : > { %604 = vrot.lane.b32.xlu0 %v1824_v5, %s1558_s25  ;;  %642 = vrot.lane.b32.xlu1 %v388_v9, %s1559_s6 }
 0x173   : > { %645 = vrot.lane.b32.xlu0 %v1824_v5, %s1557_s17  ;;  %774 = vrot.lane.b32.xlu1 %v388_v9, %s1560_s12  ;;  %s912_s12 = scalar_lea.sflag [#allocation12], %s1807_s10 }
 0x177   : > { %777 = vrot.lane.b32.xlu1 %v1824_v5, %s1559_s6  ;;  %390 = vrot.lane.b32.xlu0 %v388_v9, %s1556_s27  ;;  %s1132_s27 = sshll.u32 %s1535_s21, 8 }
 0x178   : > { %s1859_s6 = scalar_lea.hbm %s1961_s5, %s1132_s27 }
 0x17b   : > { %649 = vrot.lane.b32.xlu1 %v386_v3, %s1561_s11  ;;  %781 = vrot.lane.b32.xlu0 %v386_v3, %s1562_s18 }
 0x1d9   : > { %v473_v11 = vpop.permute.xlu1 %472  ;;  %v395_v12 = vpop.permute.xlu0 %394 }
 0x1dd   : > { %v513_v14 = vpop.permute.xlu0 %512  ;;  %v510_v15 = vpop.permute.xlu1 %509 }
 0x1de   : > { %v515_v16 = vsel %vm397_vm2, %v510_v15, %v513_v14 }
 0x1df   : > { %v521_v17 = vmul.f32 %v515_v16, %v387_v13 }
 0x1e1   : > { %v605_v18 = vpop.permute.xlu0 %604  ;;  %523 = vrot.lane.b32.xlu1 %v521_v17, %s1553_s28  ;;  %v643_v19 = vpop.permute.xlu1 %642  ;;  %s323_s28 = scalar_lea.vmem [#allocation11], %s1109_s29 }
 0x1e2   : > { %s943_s26 = sshll.u32 %s323_s28, 4  ;;  %s1854_s26 = int_to_ptr.vmem [resolvable:$true] %s943_s26 }
 0x1e5   : > { %v646_v20 = vpop.permute.xlu0 %645  ;;  %v775_v21 = vpop.permute.xlu1 %774 }
 0x1e6   : > { %v648_v22 = vsel %vm397_vm2, %v643_v19, %v646_v20 }
 0x1e7   : > { %v653_v23 = vmul.f32 %v648_v22, %v387_v13 }
 0x1e9   : > { %655 = vrot.lane.b32.xlu1 %v653_v23, %s1561_s11  ;;  %v778_v24 = vpop.permute.xlu1 %777  ;;  %v391_v25 = vpop.permute.xlu0 %390  ;;  %s1421_s11 = scalar_lea.vmem %s1854_s26, 256 }
 0x1ea   : > { %v780_v26 = vsel %vm397_vm2, %v775_v21, %v778_v24  ;;  %v398_v27 = vsel %vm397_vm2, %v391_v25, %v395_v12  ;;  %p1422_p11 = scmp.ne.s32.totalorder %s1854_s26, %s1421_s11 }
 0x1eb   : > { %v785_v28 = vmul.f32 %v780_v26, %v387_v13  ;;  %v400_v29 = vmul.f32 %v398_v27, %v387_v13 }
 0x1ec   : > { %p1423_p6 = pnand %p1422_p11, %p1752_p10 }
 0x1ed   : > { %787 = vrot.lane.b32.xlu0 %v785_v28, %s1562_s18  ;;  %v401_v31 = vadd.f32 %v400_v29, %v399_v30  ;;  %v650_v33 = vpop.permute.xlu1 %649  ;;  %v782_v39 = vpop.permute.xlu0 %781  ;;  %s1568_s18 = smov [#allocation11]  }
 0x1ee   : > { %v652_v38 = vmul.f32 %v650_v33, %v1824_v5  ;;  %v784_v42 = vmul.f32 %v782_v39, %v1824_v5  ;;  %p1424_p3 = pneg %p1423_p6 }
 0x1ef   : > { %v1277_v32 = vpack.i.bf16 %v1824_v5, %v401_v31 }
 0x1f1   : > { %736 = vrot.lane.b32.xlu0 %v1824_v5, %s1563_s14  ;;  %s1425_s14 = sshll.u32 %s1568_s18, 4  ;;  %s1426_s14 = int_to_ptr.vmem [resolvable:$false] %s1425_s14 }
 0x1f2   : > { %p1428_p5 = scmp.lt.s32.totalorder %s1854_s26, %s1426_s14 }
 0x1f5   : > { %868 = vrot.lane.b32.xlu0 %v1824_v5, %s1564_s15  ;;  %s1427_s15 = scalar_lea.vmem %s1426_s14, 512 }
 0x1f6   : > { %p1429_p7 = scmp.lt.s32.totalorder %s1427_s15, %s1421_s11 }
 0x1f8   : > { %p1430_p9 = por %p1429_p7, %p1428_p5 }
 0x1fa   : > { %p1431_p0 = pnand %p1430_p9, %p1424_p3 }
 0x213   : > { %475 = vxpose.xlu0.b32.start.end [1/1] (short) (narrow) %v473_v11, 8 }
 0x217   : > { %607 = vxpose.xlu0.b32.start.end [1/1] (short) (narrow) %v605_v18, 8 }
 0x253   : > { %v524_v35 = vpop.permute.xlu1 %523 }
 0x254   : > { %v526_v36 = vadd.f32 %v524_v35, %v520_v34 }
 0x256   : > { %v1262_v37 = vpack.i.bf16 %v1824_v5, %v526_v36 }
 0x258   : > { %1263 = vrot.lane.b32.xlu1 %v1262_v37, %s1565_s16 }
 0x25b   : > { %v656_v40 = vpop.permute.xlu1 %655 }
 0x25c   : > { %v658_v41 = vadd.f32 %v656_v40, %v652_v38 }
 0x25e   : > { %v1267_v43 = vpack.i.bf16 %v1824_v5, %v658_v41 }
 0x25f   : > { %v788_v44 = vpop.permute.xlu0 %787 }
 0x260   : > { %v790_v45 = vadd.f32 %v788_v44, %v784_v42  ;;  %1268 = vrot.lane.b32.xlu1 %v1267_v43, %s1566_s9 }
 0x262   : > { %v1272_v46 = vpack.i.bf16 %v1824_v5, %v790_v45 }
 0x263   : > { %v737_v47 = vpop.permute.xlu0 %736 }
 0x264   : > { %1273 = vrot.lane.b32.xlu1 %v1272_v46, %s1567_s24  ;;  %739 = vxpose.xlu0.b32.start.end [1/1] (short) (narrow) %v737_v47, 8 }
 0x267   : > { %v869_v48 = vpop.permute.xlu0 %868 }
 0x268   : > { %871 = vxpose.xlu0.b32.start.end [1/1] (short) (narrow) %v869_v48, 8 }
 0x28d   : > { %1278 = vxpose.xlu1.b32.start.end [1/1] (short) (narrow) %v1277_v32, 8 }
 0x293   : > { %v491_v49 = vpop.trf.xlu0 }
 0x294   : > { %v507_v50 = vpack.c.bf16 %v491_v49, %v491_v49 }
 0x296   : > { %508 = vst.msk [vmem:[%s323_s28] sm:$0xf] %vm435_vm3, %v507_v50 }
 0x297   : > { %v623_v53 = vpop.trf.xlu0 }
 0x298   : > { %v639_v54 = vpack.c.bf16 %v623_v53, %v623_v53 }
 0x29a   : > { %1116 = vst.msk [vmem:[%s323_s28 + $0x4] sm:$0xf] %vm435_vm3, %v639_v54 }
 0x2ca   : > { %v1264_v51 = vpop.permute.xlu1 %1263 }
 0x2cb   : > { %1285 = vxpose.xlu1.b32.start.end [1/1] (short) (narrow) %v1264_v51, 8 }
 0x2d2   : > { %v1269_v52 = vpop.permute.xlu1 %1268 }
 0x2d3   : > { %1292 = vxpose.xlu1.b32.start.end [1/1] (short) (narrow) %v1269_v52, 8 }
 0x2d6   : > { %v1274_v55 = vpop.permute.xlu1 %1273 }
 0x2d7   : > { %1299 = vxpose.xlu1.b32.start.end [1/1] (short) (narrow) %v1274_v55, 8 }
 0x2e4   : > { %v755_v56 = vpop.trf.xlu0 }
 0x2e5   : > { %v771_v57 = vpack.c.bf16 %v755_v56, %v755_v56 }
 0x2e7   : > { %1119 = vst.msk [vmem:[%s323_s28 + $0x8] sm:$0xf] %vm435_vm3, %v771_v57 }
 0x2e8   : > { %v887_v58 = vpop.trf.xlu0 }
 0x2e9   : > { %v903_v59 = vpack.c.bf16 %v887_v58, %v887_v58 }
 0x2eb   : > { %1122 = vst.msk [vmem:[%s323_s28 + $0xc] sm:$0xf] %vm435_vm3, %v903_v59 }
 0x2ec   : > { %1434 = shalt.err (!%p1431_p0)
}
 0x2ed   : > { %s1435_s16 = scalar_lea.hbm %s1859_s6, 256  ;;  %s1439_s29 = scalar_lea.hbm %s1961_s5, 512 }
 0x2ee   : > { %p1436_p4 = scmp.ne.s32.totalorder %s1859_s6, %s1435_s16  ;;  %p1440_p1 = scmp.lt.u32.totalorder %s1859_s6, %s1961_s5 }
 0x2ef   : > { %p1441_p12 = scmp.lt.u32.totalorder %s1439_s29, %s1435_s16  ;;  %p1443_p11 = scmp.lt.u32.totalorder %s1435_s16, %s1859_s6 }
 0x2f0   : > { %p1437_p2 = pnand %p1436_p4, %p1752_p10 }
 0x2f1   : > { %p1442_p13 = por %p1441_p12, %p1440_p1 }
 0x2f2   : > { %p1438_p8 = pneg %p1437_p2 }
 0x2f3   : > { %p1444_p6 = por %p1443_p11, %p1442_p13 }
 0x2f5   : > { %p1445_p3 = pnand %p1444_p6, %p1438_p8 }
 0x2f7   : > { %1448 = shalt.err (!%p1445_p3)
}
 0x2f8   : > { %s1569_s17 = smov 64   ;;  %s1108_s25 = sshll.u32 %s1807_s10, 5 }
 0x2f9   : > { %1159 = dma.vmem_to_hbm [thread:$0]  (%p1752_p10), %s1854_s26, 256, %s1859_s6, %s912_s12, %s1569_s17, %s1569_s17, %s1555_s30  }
 0x2fa   : > { %s316_s11 = scalar_lea.vmem [#allocation10], %s1108_s25  ;;  %s1131_s26 = sshll.u32 %s1535_s21, 9 }
 0x2fb   : > { %s926_s6 = sshll.u32 %s316_s11, 4  ;;  %s1900_s14 = scalar_lea.hbm %s1960_s4, %s1131_s26  ;;  %s1902_s6 = int_to_ptr.vmem [resolvable:$true] %s926_s6 }
 0x2fc   : > { %s907_s21 = scalar_lea.sflag [#allocation4], %s1807_s10  ;;  %s1449_s15 = scalar_lea.vmem %s1902_s6, 512 }
 0x2fd   : > { %p1450_p5 = scmp.ne.s32.totalorder %s1902_s6, %s1449_s15  ;;  %s1570_s16 = smov [#allocation10]  }
 0x2fe   : > { %s1453_s9 = sshll.u32 %s1570_s16, 4  ;;  %s1454_s9 = int_to_ptr.vmem [resolvable:$false] %s1453_s9 }
 0x2ff   : > { %p1451_p7 = pnand %p1450_p5, %p1752_p10  ;;  %s1455_s24 = scalar_lea.vmem %s1454_s9, 1024 }
 0x300   : > { %p1456_p0 = scmp.lt.s32.totalorder %s1902_s6, %s1454_s9  ;;  %p1457_p4 = scmp.lt.s32.totalorder %s1455_s24, %s1449_s15 }
 0x301   : > { %p1452_p9 = pneg %p1451_p7 }
 0x302   : > { %p1458_p2 = por %p1457_p4, %p1456_p0 }
 0x304   : > { %p1459_p8 = pnand %p1458_p2, %p1452_p9 }
 0x30d   : > { %v1279_v60 = vpop.trf.xlu1 }
 0x30e   : > { %v1283_v61 = vunpack.i.h.bf16 %v1279_v60  ;;  %v1280_v62 = vunpack.i.l.bf16 %v1279_v60 }
 0x310   : > { %v469_v63 = vpack.c.bf16 %v1283_v61, %v1283_v61  ;;  %v434_v0 = vpack.c.bf16 %v1280_v62, %v1280_v62 }
 0x312   : > { %1113 = vst.msk [vmem:[%s316_s11 + $0x10] sm:$0xf] %vm435_vm3, %v469_v63  ;;  %436 = vst.msk [vmem:[%s316_s11] sm:$0xf] %vm435_vm3, %v434_v0 }
 0x34b   : > { %v1286_v1 = vpop.trf.xlu1 }
 0x34c   : > { %v1290_v2 = vunpack.i.h.bf16 %v1286_v1  ;;  %v1287_v3 = vunpack.i.l.bf16 %v1286_v1 }
 0x34e   : > { %v601_v4 = vpack.c.bf16 %v1290_v2, %v1290_v2  ;;  %v563_v5 = vpack.c.bf16 %v1287_v3, %v1287_v3 }
 0x350   : > { %1115 = vst.msk [vmem:[%s316_s11 + $0x14] sm:$0xf] %vm435_vm3, %v601_v4  ;;  %1114 = vst.msk [vmem:[%s316_s11 + $0x4] sm:$0xf] %vm435_vm3, %v563_v5 }
 0x353   : > { %v1293_v6 = vpop.trf.xlu1 }
 0x354   : > { %v1297_v7 = vunpack.i.h.bf16 %v1293_v6  ;;  %v1294_v8 = vunpack.i.l.bf16 %v1293_v6 }
 0x356   : > { %v733_v9 = vpack.c.bf16 %v1297_v7, %v1297_v7  ;;  %v695_v10 = vpack.c.bf16 %v1294_v8, %v1294_v8 }
 0x357   : > { %v1300_v11 = vpop.trf.xlu1 }
 0x358   : > { %1118 = vst.msk [vmem:[%s316_s11 + $0x18] sm:$0xf] %vm435_vm3, %v733_v9  ;;  %1117 = vst.msk [vmem:[%s316_s11 + $0x8] sm:$0xf] %vm435_vm3, %v695_v10  ;;  %v1304_v12 = vunpack.i.h.bf16 %v1300_v11  ;;  %v1301_v13 = vunpack.i.l.bf16 %v1300_v11 }
 0x35a   : > { %v865_v14 = vpack.c.bf16 %v1304_v12, %v1304_v12  ;;  %v827_v15 = vpack.c.bf16 %v1301_v13, %v1301_v13 }
 0x35c   : > { %1121 = vst.msk [vmem:[%s316_s11 + $0x1c] sm:$0xf] %vm435_vm3, %v865_v14  ;;  %1120 = vst.msk [vmem:[%s316_s11 + $0xc] sm:$0xf] %vm435_vm3, %v827_v15 }
 0x35d   : > { %1462 = shalt.err (!%p1459_p8)
}
 0x35e   : > { %s1463_s29 = scalar_lea.hbm %s1900_s14, 512  ;;  %s1467_s25 = scalar_lea.hbm %s1960_s4, 1024 }
 0x35f   : > { %p1464_p1 = scmp.ne.s32.totalorder %s1900_s14, %s1463_s29  ;;  %p1468_p11 = scmp.lt.u32.totalorder %s1900_s14, %s1960_s4 }
 0x360   : > { %p1469_p6 = scmp.lt.u32.totalorder %s1467_s25, %s1463_s29  ;;  %p1471_p5 = scmp.lt.u32.totalorder %s1463_s29, %s1900_s14 }
 0x361   : > { %p1465_p12 = pnand %p1464_p1, %p1752_p10 }
 0x362   : > { %p1470_p3 = por %p1469_p6, %p1468_p11 }
 0x363   : > { %p1466_p13 = pneg %p1465_p12 }
 0x364   : > { %p1472_p7 = por %p1471_p5, %p1470_p3 }
 0x366   : > { %p1473_p9 = pnand %p1472_p7, %p1466_p13 }
 0x368   : > { %1476 = shalt.err (!%p1473_p9)
}
 0x369   : > { %1158 = dma.vmem_to_hbm [thread:$0]  (%p1752_p10), %s1902_s6, 512, %s1900_s14, %s907_s21, %s1569_s17, %s1569_s17, %s1555_s30  }
 0x36a PF: > { %s1983_s12 = sld [smem:[#allocation18_spill]]  ;;  %s1984_s18 = sld [smem:[#allocation19_spill]] }
 0x36b   : > { %p1986_p4 = scmp.ge.s32.totalorder %s1543_s23, 2 }
 0x370   : > { %s958_s15 = sand.u32 1, %s1983_s12   ;;  %p1985_p0 = scmp.ne.s32.totalorder %s1984_s18, 0 }
 0x371   : > { %s959_s16 = scalar_lea.sflag [#allocation4], %s958_s15 }
 0x372   : > { %p1177_p2 = pnand %p1986_p4, %p1985_p0 }
 0x374   : > { %1514 = dma.done.wait (!%p1177_p2), %s959_s16, 512  }
 0x375   : > { %1516 = vsyncadd (!%p1177_p2), %s959_s16, 4294966784  ;;  %s968_s8 = scalar_lea.sflag [#allocation12], %s958_s15 }
 0x376   : > { %1518 = dma.done.wait (!%p1177_p2), %s968_s8, 256  }
 0x377   : > { %1520 = vsyncadd (!%p1177_p2), %s968_s8, 4294967040  ;;  %s27_s23 = sadd.s32 1, %s1543_s23   ;;  %s1987_s18 = smov %s1527_s19 }
 0x378   : > { %p24_p8 = scmp.ge.s32.totalorder %s27_s23, 4   ;;  %s1988_s19 = smov %s1531_s20 }
 0x379   : > { %s1989_s20 = smov %s1764_s13  ;;  %s1990_s21 = smov %s1539_s22 }
 0x37a   : > { %s1991_s22 = smov %s1993_s7  ;;  %26 = sbr.rel (!%p24_p8) target bundleno = 10 (0xa), region = 122 }
 0x381   :  { %973 = vsyncpa [#allocation3], 1 }
 0x382   :  { %975 = vsyncpa [#allocation3 + $0x1], 1 }
 0x383   :  { %976 = vsyncpa [#allocation6], 1 }
 0x384   :  { %977 = vsyncpa [#allocation9], 1 }
 0x385   :  { %978 = vsyncpa [#allocation4], 1 }
 0x386   :  { %980 = vsyncpa [#allocation4 + $0x1], 1 }
 0x387   :  { %981 = vsyncpa [#allocation12], 1 }
 0x388   :  { %983 = vsyncpa [#allocation12 + $0x1], 1 }

</bundles_post_ra>
